<compile_context>
chip_gen: v5e
topology: v5e:2x2
jax: 0.10.0
libtpu: 0.0.40
codegen_flags: <defaults>
</compile_context>

<pallas_src>
from math import sqrt

import jax
import jax.numpy as jnp
from jax.experimental import pallas as pl
from jax.experimental.pallas import tpu as pltpu


def _round_up(x, m):
    return ((x + m - 1) // m) * m


def _news_head_kernel(cls_ref, mask_ref, wfc_ref, bfc_ref, wnl_ref, bnl_ref,
                      out_ref, acc_ref):
    """Grid = (batch, news_tiles). Reduction over news tiles into acc_ref."""
    t = pl.program_id(1)

    @pl.when(t == 0)
    def _():
        acc_ref[...] = jnp.zeros_like(acc_ref)

    cls_blk = cls_ref[0].astype(jnp.float32)      # (tile_n, Hb)
    mask_blk = mask_ref[0]                        # (tile_n, 1)

    # fc logits: lane-dense (tile_n, 128) MXU matmul; column 0 of the padded
    # weight holds row 1 of the torch fc weight (the only row the forward uses).
    score_full = jnp.dot(cls_blk, wfc_ref[...],
                         preferred_element_type=jnp.float32)
    # slice the real logit column first, then add the scalar bias (narrow
    # (tile_n, 1) add instead of a (tile_n, 128) broadcast add).
    score = score_full[:, 0:1] + bfc_ref[...]     # (tile_n, 1)

    # torch.where(valid_mask > 0, logit_1, 0.0)
    score = jnp.where(mask_blk > 0, score, 0.0)

    # partial day-level embedding: sum_n score_n * cls_n  -> (1, Hb)
    acc_ref[...] += jnp.sum(score * cls_blk, axis=0, keepdims=True)

    @pl.when(t == pl.num_programs(1) - 1)
    def _():
        out = jnp.dot(acc_ref[...], wnl_ref[...],
                      preferred_element_type=jnp.float32) + bnl_ref[...]
        out_ref[0] = out.astype(out_ref.dtype)    # (1, Hp)


def news_bert_head(cls_hidden, valid_mask, params, *, news_tile=None):
    """cls_hidden: (B, num_news, Hb)  valid_mask: (B, num_news, 1)
    Returns textual_event_embedding: (B, 1, hidden_dim)."""
    B, num_news, Hb = cls_hidden.shape
    hidden_dim = params["news_linear_w"].shape[0]
    assert Hb % 128 == 0, "BERT hidden size must be lane-aligned (768 is)"

    if news_tile is None:
        # whole news axis in one tile when it fits; cap tiles at 512 rows.
        news_tile = min(_round_up(num_news, 8), 512)
    Np = _round_up(num_news, news_tile)
    n_tiles = Np // news_tile
    Hp = _round_up(hidden_dim, 128)               # lane-dense output width

    f32 = jnp.float32
    mask_f = valid_mask.astype(f32)
    if Np != num_news:
        # pad the news axis; padded rows carry a zero mask so they contribute 0.
        cls_p = jnp.zeros((B, Np, Hb), cls_hidden.dtype).at[:, :num_news, :].set(
            cls_hidden)
        mask_p = jnp.zeros((B, Np, 1), f32).at[:, :num_news, :].set(mask_f)
    else:
        cls_p, mask_p = cls_hidden, mask_f

    # fc row 1 (the only column used by the forward) padded to 128 lanes.
    wfc_pad = jnp.zeros((Hb, 128), f32).at[:, 0].set(params["fc_w"][1].astype(f32))
    bfc = params["fc_b"][1].astype(f32).reshape(1, 1)
    # news_linear: nn.Linear computes x @ W^T; pre-transpose, pad output lanes.
    wnl_pad = jnp.zeros((Hb, Hp), f32).at[:, :hidden_dim].set(
        params["news_linear_w"].T.astype(f32))
    bnl_pad = jnp.zeros((1, Hp), f32).at[0, :hidden_dim].set(
        params["news_linear_b"].astype(f32))

    out = pl.pallas_call(
        _news_head_kernel,
        out_shape=jax.ShapeDtypeStruct((B, 1, Hp), jnp.float32),
        grid_spec=pltpu.PrefetchScalarGridSpec(
            num_scalar_prefetch=0,
            grid=(B, n_tiles),
            in_specs=[
                pl.BlockSpec((1, news_tile, Hb), lambda b, t: (b, t, 0)),
                pl.BlockSpec((1, news_tile, 1), lambda b, t: (b, t, 0)),
                # weight blocks: constant index maps -> stay resident in VMEM
                pl.BlockSpec((Hb, 128), lambda b, t: (0, 0)),
                pl.BlockSpec((1, 1), lambda b, t: (0, 0)),
                pl.BlockSpec((Hb, Hp), lambda b, t: (0, 0)),
                pl.BlockSpec((1, Hp), lambda b, t: (0, 0)),
            ],
            out_specs=pl.BlockSpec((1, 1, Hp), lambda b, t: (b, 0, 0)),
            scratch_shapes=[pltpu.VMEM((1, Hb), jnp.float32)],
        ),
        compiler_params=pltpu.CompilerParams(
            dimension_semantics=("parallel", "arbitrary"),
            vmem_limit_bytes=32 * 1024 * 1024),
    )(cls_p, mask_p, wfc_pad, bfc, wnl_pad, bnl_pad)

    return out[:, :, :hidden_dim]


def news_bert_head_reference(cls_hidden, valid_mask, params):
    """Pure-JAX reference matching the PyTorch forward (post-BERT part)."""
    logits = jnp.einsum('bnh,oh->bno', cls_hidden, params["fc_w"]) + params["fc_b"]
    valid_logits = jnp.where(valid_mask > 0, logits[..., 1:2], 0.0)
    day = jnp.sum(valid_logits * cls_hidden, axis=1, keepdims=True)   # (B,1,Hb)
    out = jnp.einsum('bkh,oh->bko', day, params["news_linear_w"]) \
        + params["news_linear_b"]
    return out                                                        # (B,1,Hd)


def init_params(key, bert_hidden, hidden_dim):
    k1, k2, k3, k4 = jax.random.split(key, 4)
    bound = 1.0 / sqrt(bert_hidden)
    u = lambda k, shp: jax.random.uniform(k, shp, jnp.float32, -bound, bound)
    return {
        "fc_w": u(k1, (2, bert_hidden)),
        "fc_b": u(k2, (2,)),
        "news_linear_w": u(k3, (hidden_dim, bert_hidden)),
        "news_linear_b": u(k4, (hidden_dim,)),
    }


if __name__ == "__main__":
    # Shapes consistent with the module (small demo sizes):
    #   daily_news_input_ids: (B, seq, num_news, num_tokens) -> BERT (external)
    B, seq_len, num_news, num_tokens = 2, 4, 16, 8
    bert_hidden, hidden_dim = 768, 32

    key = jax.random.PRNGKey(0)
    k_cls, k_mask, k_p = jax.random.split(key, 3)

    # Simulated BERT [CLS] last-hidden-state for day i (encoder is external).
    cls_hidden = jax.random.normal(k_cls, (B, num_news, bert_hidden), jnp.float32)
    daily_valid_news_mask = (
        jax.random.uniform(k_mask, (B, seq_len, num_news, 1)) > 0.3
    ).astype(jnp.float32)
    valid_mask = daily_valid_news_mask[:, -1, :, :]          # (B, num_news, 1)

    params = init_params(k_p, bert_hidden, hidden_dim)

    out = news_bert_head(cls_hidden, valid_mask, params)
    jax.block_until_ready(out)

    ref = news_bert_head_reference(cls_hidden, valid_mask, params)
    assert out.shape == (B, 1, hidden_dim)
    assert jnp.allclose(out, ref, atol=1e-4, rtol=1e-4), \
        float(jnp.max(jnp.abs(out - ref)))
    print("KERNEL_OK")
</pallas_src>

<mosaic_0001>
module attributes {stable_mosaic.version = 11 : i64} {
  func.func @_news_head_kernel(%arg0: i32, %arg1: i32, %arg2: memref<1x16x768xf32, #tpu.memory_space<vmem>>, %arg3: memref<1x16x1xf32, #tpu.memory_space<vmem>>, %arg4: memref<768x128xf32, #tpu.memory_space<vmem>>, %arg5: memref<1x1xf32, #tpu.memory_space<vmem>>, %arg6: memref<768x128xf32, #tpu.memory_space<vmem>>, %arg7: memref<1x128xf32, #tpu.memory_space<vmem>>, %arg8: memref<1x1x128xf32, #tpu.memory_space<vmem>>, %arg9: memref<1x768xf32, #tpu.memory_space<vmem>>) attributes {dimension_semantics = [#tpu.dimension_semantics<parallel>, #tpu.dimension_semantics<arbitrary>], iteration_bounds = array<i64: 2, 1>, scalar_prefetch = 0 : i64, scratch_operands = 1 : i64, tpu.core_type = #tpu.core_type<tc>, window_params = [{transform_indices = @transform_0, window_bounds = array<i64: 1, 16, 768>}, {transform_indices = @transform_1, window_bounds = array<i64: 1, 16, 1>}, {pipeline_mode = #tpu.pipeline_mode<synchronous>, transform_indices = @transform_2, window_bounds = array<i64: 768, 128>}, {pipeline_mode = #tpu.pipeline_mode<synchronous>, transform_indices = @transform_3, window_bounds = array<i64: 1, 1>}, {pipeline_mode = #tpu.pipeline_mode<synchronous>, transform_indices = @transform_4, window_bounds = array<i64: 768, 128>}, {pipeline_mode = #tpu.pipeline_mode<synchronous>, transform_indices = @transform_5, window_bounds = array<i64: 1, 128>}, {transform_indices = @transform_6, window_bounds = array<i64: 1, 1, 128>}]} {
    %c0_i32 = arith.constant 0 : i32
    %0 = arith.cmpi eq, %arg1, %c0_i32 : i32
    %1 = arith.extui %0 : i1 to i32
    %c0_i32_0 = arith.constant 0 : i32
    %2 = arith.cmpi ne, %1, %c0_i32_0 : i32
    scf.if %2 {
      %cst_19 = arith.constant 0.000000e+00 : f32
      %27 = vector.broadcast %cst_19 : f32 to vector<1x768xf32>
      %c0_20 = arith.constant 0 : index
      %c0_21 = arith.constant 0 : index
      %28 = vector.load %arg9[%c0_20, %c0_21] : memref<1x768xf32, #tpu.memory_space<vmem>>, vector<1x768xf32>
      tpu.vector_store %arg9[%c0_20, %c0_21], %27 {strides = array<i32>} : memref<1x768xf32, #tpu.memory_space<vmem>>, vector<1x768xf32>,
    } else {
    }
    %c0 = arith.constant 0 : index
    %c0_1 = arith.constant 0 : index
    %c0_2 = arith.constant 0 : index
    %3 = vector.load %arg2[%c0, %c0_1, %c0_2] : memref<1x16x768xf32, #tpu.memory_space<vmem>>, vector<1x16x768xf32>
    %4 = vector.shape_cast %3 : vector<1x16x768xf32> to vector<16x768xf32>
    %c0_3 = arith.constant 0 : index
    %c0_4 = arith.constant 0 : index
    %c0_5 = arith.constant 0 : index
    %5 = vector.load %arg3[%c0_3, %c0_4, %c0_5] : memref<1x16x1xf32, #tpu.memory_space<vmem>>, vector<1x16x1xf32>
    %6 = vector.shape_cast %5 : vector<1x16x1xf32> to vector<16x1xf32>
    %c0_6 = arith.constant 0 : index
    %c0_7 = arith.constant 0 : index
    %7 = vector.load %arg4[%c0_6, %c0_7] : memref<768x128xf32, #tpu.memory_space<vmem>>, vector<768x128xf32>
    %cst = arith.constant dense<0.000000e+00> : vector<16x128xf32>
    %8 = tpu.matmul %4, %7, %cst {dimension_numbers = #tpu.dot_dimension_numbers<[1], [0], [0], [1], [0, 0, 1, 1], [], []>} : vector<16x768xf32>, vector<768x128xf32>, vector<16x128xf32> -> vector<16x128xf32>
    %9 = vector.extract_strided_slice %8 {offsets = [0, 0], sizes = [16, 1], strides = [1, 1]} : vector<16x128xf32> to vector<16x1xf32>
    %c0_8 = arith.constant 0 : index
    %c0_9 = arith.constant 0 : index
    %10 = vector.load %arg5[%c0_8, %c0_9] : memref<1x1xf32, #tpu.memory_space<vmem>>, vector<1x1xf32>
    %11 = vector.broadcast %10 : vector<1x1xf32> to vector<16x1xf32>
    %12 = arith.addf %9, %11 : vector<16x1xf32>
    %cst_10 = arith.constant 0.000000e+00 : f32
    %13 = vector.broadcast %cst_10 : f32 to vector<16x1xf32>
    %14 = arith.cmpf ogt, %6, %13 : vector<16x1xf32>
    %cst_11 = arith.constant 0.000000e+00 : f32
    %15 = vector.broadcast %cst_11 : f32 to vector<16x1xf32>
    %16 = arith.select %14, %12, %15 : vector<16x1xi1>, vector<16x1xf32>
    %c0_12 = arith.constant 0 : index
    %c0_13 = arith.constant 0 : index
    %17 = vector.load %arg9[%c0_12, %c0_13] : memref<1x768xf32, #tpu.memory_space<vmem>>, vector<1x768xf32>
    %18 = vector.broadcast %16 : vector<16x1xf32> to vector<16x768xf32>
    %19 = arith.mulf %18, %4 : vector<16x768xf32>
    %cst_14 = arith.constant dense<0.000000e+00> : vector<768xf32>
    %20 = vector.multi_reduction <add>, %19, %cst_14 [0] : vector<16x768xf32> to vector<768xf32>
    %21 = vector.shape_cast %20 : vector<768xf32> to vector<1x768xf32>
    %22 = arith.addf %17, %21 : vector<1x768xf32>
    %c0_15 = arith.constant 0 : index
    %c0_16 = arith.constant 0 : index
    %23 = vector.load %arg9[%c0_15, %c0_16] : memref<1x768xf32, #tpu.memory_space<vmem>>, vector<1x768xf32>
    tpu.vector_store %arg9[%c0_15, %c0_16], %22 {strides = array<i32>} : memref<1x768xf32, #tpu.memory_space<vmem>>, vector<1x768xf32>,
    %c0_i32_17 = arith.constant 0 : i32
    %24 = arith.cmpi eq, %arg1, %c0_i32_17 : i32
    %25 = arith.extui %24 : i1 to i32
    %c0_i32_18 = arith.constant 0 : i32
    %26 = arith.cmpi ne, %25, %c0_i32_18 : i32
    scf.if %26 {
      %c0_19 = arith.constant 0 : index
      %c0_20 = arith.constant 0 : index
      %27 = vector.load %arg9[%c0_19, %c0_20] : memref<1x768xf32, #tpu.memory_space<vmem>>, vector<1x768xf32>
      %c0_21 = arith.constant 0 : index
      %c0_22 = arith.constant 0 : index
      %28 = vector.load %arg6[%c0_21, %c0_22] : memref<768x128xf32, #tpu.memory_space<vmem>>, vector<768x128xf32>
      %cst_23 = arith.constant dense<0.000000e+00> : vector<1x128xf32>
      %29 = tpu.matmul %27, %28, %cst_23 {dimension_numbers = #tpu.dot_dimension_numbers<[1], [0], [0], [1], [0, 0, 1, 1], [], []>} : vector<1x768xf32>, vector<768x128xf32>, vector<1x128xf32> -> vector<1x128xf32>
      %c0_24 = arith.constant 0 : index
      %c0_25 = arith.constant 0 : index
      %30 = vector.load %arg7[%c0_24, %c0_25] : memref<1x128xf32, #tpu.memory_space<vmem>>, vector<1x128xf32>
      %31 = arith.addf %29, %30 : vector<1x128xf32>
      %c0_26 = arith.constant 0 : index
      %c0_27 = arith.constant 0 : index
      %c0_28 = arith.constant 0 : index
      %32 = vector.load %arg8[%c0_26, %c0_27, %c0_28] : memref<1x1x128xf32, #tpu.memory_space<vmem>>, vector<1x1x128xf32>
      %33 = vector.shape_cast %32 : vector<1x1x128xf32> to vector<1x128xf32>
      %34 = vector.shape_cast %31 : vector<1x128xf32> to vector<1x1x128xf32>
      tpu.vector_store %arg8[%c0_26, %c0_27, %c0_28], %34 {strides = array<i32>} : memref<1x1x128xf32, #tpu.memory_space<vmem>>, vector<1x1x128xf32>,
    } else {
    }
    return
  }
  func.func @transform_0(%arg0: i32, %arg1: i32) -> (i32, i32, i32) {
    %c0_i32 = arith.constant 0 : i32
    %c0_i32_0 = arith.constant 0 : i32
    return %arg0, %arg1, %c0_i32 : i32, i32, i32
  }
  func.func @transform_1(%arg0: i32, %arg1: i32) -> (i32, i32, i32) {
    %c0_i32 = arith.constant 0 : i32
    %c0_i32_0 = arith.constant 0 : i32
    return %arg0, %arg1, %c0_i32 : i32, i32, i32
  }
  func.func @transform_2(%arg0: i32, %arg1: i32) -> (i32, i32) {
    %c0_i32 = arith.constant 0 : i32
    %c0_i32_0 = arith.constant 0 : i32
    %c0_i32_1 = arith.constant 0 : i32
    return %c0_i32, %c0_i32_0 : i32, i32
  }
  func.func @transform_3(%arg0: i32, %arg1: i32) -> (i32, i32) {
    %c0_i32 = arith.constant 0 : i32
    %c0_i32_0 = arith.constant 0 : i32
    %c0_i32_1 = arith.constant 0 : i32
    return %c0_i32, %c0_i32_0 : i32, i32
  }
  func.func @transform_4(%arg0: i32, %arg1: i32) -> (i32, i32) {
    %c0_i32 = arith.constant 0 : i32
    %c0_i32_0 = arith.constant 0 : i32
    %c0_i32_1 = arith.constant 0 : i32
    return %c0_i32, %c0_i32_0 : i32, i32
  }
  func.func @transform_5(%arg0: i32, %arg1: i32) -> (i32, i32) {
    %c0_i32 = arith.constant 0 : i32
    %c0_i32_0 = arith.constant 0 : i32
    %c0_i32_1 = arith.constant 0 : i32
    return %c0_i32, %c0_i32_0 : i32, i32
  }
  func.func @transform_6(%arg0: i32, %arg1: i32) -> (i32, i32, i32) {
    %c0_i32 = arith.constant 0 : i32
    %c0_i32_0 = arith.constant 0 : i32
    %c0_i32_1 = arith.constant 0 : i32
    return %arg0, %c0_i32, %c0_i32_0 : i32, i32, i32
  }
}

</mosaic_0001>

<bundles_post_ra>
// kernel: tpu_custom_call.1
= control target key start
LH: loop header
LB: loop body
LE: loop exit
PB: predicated region body
PF: predicated region fallthrough
CT: control target
= control target key end

     0   :  { %s1641_s0 = inlined_call_operand.hbm [shape: f32[2,16,768], index: 0, kind: input, shape index: {}]   ;;  %s1642_s1 = inlined_call_operand.vmem [shape: f32[2,16,1], index: 1, kind: input, shape index: {}]   ;;  %s1643_s2 = inlined_call_operand.hbm [shape: f32[768,128], index: 2, kind: input, shape index: {}]   ;;  %s1644_s3 = inlined_call_operand.<no memory space> [shape: f32[1,1], index: 3, kind: input, shape index: {}]   ;;  %s1645_s4 = inlined_call_operand.hbm [shape: f32[768,128], index: 4, kind: input, shape index: {}]   ;;  %s1646_s5 = inlined_call_operand.vmem [shape: f32[1,128], index: 5, kind: input, shape index: {}]   ;;  %s1647_s6 = inlined_call_operand.hbm [shape: f32[2,1,128], index: 6, kind: output, shape index: {}]  }
   0x1   :  { %1648 = sst [smem:[#allocation14_spill]] %s1643_s2  ;;  %v11_v0 = vstv %s1644_s3 }
   0x2   :  { %1649 = sst [smem:[#allocation15_spill]] %s1645_s4  ;;  %12 = vst [vmem:[#allocation3] sm:$0x1] %v11_v0 }
   0x3   :  { %13 = vsyncpa [#allocation5], 0 }
   0x4   :  { %15 = vsyncpa [#allocation5 + $0x1], 0 }
   0x5   :  { %16 = vsyncpa [#allocation8], 0 }
   0x6   :  { %17 = vsyncpa [#allocation6], 0 }
   0x7   :  { %19 = vsyncpa [#allocation6 + $0x1], 0  ;;  %s1415_s23 = smov 0   ;;  %s1417_s24 = smov 0  }
   0x8   :  { %s1419_s25 = smov 0   ;;  %s1421_s26 = smov 0  }
   0x9   :  { %s1423_s27 = smov 0   ;;  %s1425_s28 = smov 0  }
   0xa LB: > { %s1082_s3 = sadd.s32 4294967295, %s1367_s28   ;;  %s1083_s29 = sadd.s32 4294967294, %s1367_s28   ;;  %s1367_s28 = sphi %s1425_s28, %s25_s28   ;;  %s1363_s27 = sphi %s1423_s27, %s1664_s27   ;;  %s1359_s26 = sphi %s1421_s26, %s1663_s26   ;;  %s1355_s25 = sphi %s1419_s25, %s1662_s25   ;;  %s1351_s24 = sphi %s1417_s24, %s1661_s24   ;;  %s1347_s23 = sphi %s1415_s23, %s1660_s23  }
   0xb   : > { %p59_p0 = scmp.ne.s32.totalorder %s1351_s24, %s1347_s23  ;;  %p1449_p1 = scmp.eq.s32.totalorder %s1082_s3, 0 }
   0xc   : > { %p1453_p2 = scmp.eq.s32.totalorder %s1082_s3, 1  ;;  %p201_p3 = scmp.eq.s32.totalorder %s1083_s29, 1 }
   0xd   : > { %p1459_p4 = por %p1449_p1, %p59_p0  ;;  %p1084_p5 = scmp.ge.s32.totalorder %s1367_s28, 1 }
   0xe   : > { %p1464_p6 = por %p201_p3, %p59_p0  ;;  %p208_p7 = scmp.lt.s32.totalorder %s1367_s28, 3 }
   0xf   : > { %s1654_s2 = sld [smem:[#allocation14_spill]]  ;;  %s1369_s14 = smov [#allocation7]  }
  0x10   : > { %p1472_p8 = pnand %p1084_p5, %p208_p7  ;;  %s221_s15 = sshll.u32 %s1369_s14, 4  ;;  %s222_s15 = int_to_ptr.vmem [resolvable:$true] %s221_s15 }
  0x11   : > { %p1087_p11 = scmp.ge.s32.totalorder %s1367_s28, 2  ;;  %s1656_s4 = sld [smem:[#allocation15_spill]] }
  0x12   : > { %p1112_p9 = pneg %p1472_p8  ;;  %s1370_s19 = smov 128  }
  0x13   : > { %s1371_s20 = smov 8   ;;  %s1372_s21 = smov [#allocation9]  }
  0x14   : > { %p1113_p10 = pnand %p1112_p9, %p1449_p1  ;;  %s238_s22 = sshll.u32 %s1372_s21, 4  ;;  %s239_s22 = int_to_ptr.vmem [resolvable:$true] %s238_s22 }
  0x15   : > { %s219_s12 = sshll.u32 %s1654_s2, 4  ;;  %s37_s3 = sadd.s32 1, %s1363_s27  ;;  %s220_s12 = int_to_ptr.hbm [resolvable:$true] %s219_s12 }
  0x16   : > { %1115 = dma.hbm_to_vmem [thread:$0]  (!%p1113_p10), %s220_s12, 12288, %s222_s15, [#allocation8], %s1370_s19, %s1370_s19, %s1371_s20  }
  0x17   : > { %s236_s18 = sshll.u32 %s1656_s4, 4  ;;  %s46_s29 = sadd.s32 1, %s1355_s25  ;;  %s237_s18 = int_to_ptr.hbm [resolvable:$true] %s236_s18 }
  0x18   : > { %1118 = dma.hbm_to_vmem [thread:$0]  (!%p1113_p10), %s237_s18, 12288, %s239_s22, [#allocation8], %s1370_s19, %s1370_s19, %s1371_s20  }
  0x19   : > { %p39_p12 = scmp.ge.s32.totalorder %s37_s3, 2  ;;  %p53_p13 = scmp.ne.s32.totalorder %s1355_s25, %s1351_s24 }
  0x1a   : > { %p54_p0 = scmp.eq.s32.totalorder %s1367_s28, 0  ;;  %p1129_p3 = scmp.lt.s32.totalorder %s1367_s28, 2 }
  0x1b   : > { %s1666_s3 = smov (%p39_p12, %s37_s3), 0  ;;  %p1494_p7 = por %p1453_p2, %p53_p13 }
  0x1c   : > { %p55_p5 = por %p54_p0, %p53_p13  ;;  %s41_s11 = ssub.s32 %s1363_s27, %s1666_s3 }
  0x1d   : > { %s255_s12 = sand.u32 1, %s1355_s25   ;;  %p44_p9 = scmp.eq.s32.totalorder %s41_s11, 0 }
  0x1e   : > { %s1097_s14 = smul.u32 96, %s255_s12  ;;  %p1120_p10 = pnand %p1129_p3, %p55_p5 }
  0x1f   : > { %s1502_s15 = scalar_select %p44_p9, %s1355_s25, %s46_s29  }
  0x20   : > { %s1098_s16 = smul.u32 96, %s1363_s27  ;;  %s259_s17 = scalar_lea.vmem [#allocation4], %s1097_s14 }
  0x21   : > { %s270_s18 = sshll.u32 %s259_s17, 4  ;;  %s256_s22 = scalar_lea.sflag [#allocation5], %s255_s12  ;;  %s271_s18 = int_to_ptr.vmem [resolvable:$true] %s270_s18 }
  0x22   : > { %s267_s21 = scalar_lea.hbm %s1641_s0, %s1098_s16  ;;  %s1373_s2 = smov 768  }
  0x23   : > { %s268_s7 = sshll.u32 %s267_s21, 4  ;;  %s1374_s4 = smov 48   ;;  %s269_s7 = int_to_ptr.hbm [resolvable:$true] %s268_s7 }
  0x24   : > { %1122 = dma.hbm_to_vmem [thread:$0]  (!%p1120_p10), %s269_s7, 1536, %s271_s18, %s256_s22, %s1373_s2, %s1373_s2, %s1374_s4  }
  0x25   : > { %295 = sbr.rel (%p1472_p8) target bundleno = 546 (0x222), region = 44  ;;  %s1511_s29 = sand.u32 (!%p1472_p8), 1, %s1351_s24  }
  0x26   : > { %s1099_s11 = smul.u32 (!%p1472_p8), 96, %s1511_s29  ;;  %s298_s14 = scalar_lea.sflag (!%p1472_p8), [#allocation5], %s1511_s29 }
  0x28   : > { %s1515_s17 = scalar_lea.vmem (!%p1472_p8), [#allocation4], %s1099_s11 }
  0x2a   : > { %1334 = dma.done.wait (%p1459_p4), %s298_s14, 1536  }
  0x2b   : > { %1336 = vsyncadd (%p1459_p4), %s298_s14, 4294965760 }
  0x2c   : > { %1338 = dma.done.wait (%p1449_p1), [#allocation8], 24576  }
  0x2d   : > { %1340 = vsyncadd (%p1449_p1), [#allocation8], 4294942720  ;;  %v398_v1 = vld [vmem:[#allocation7 + $0x78] sm:$0xff]  ;;  %v397_v2 = vld [vmem:[#allocation7 + $0x70] sm:$0xff]  ;;  %p351_p1 = scmp.lt.s32.totalorder %s1359_s26, 1  ;;  %vm703_vm3 = vcmask 1040384   ;;  %s964_s20 = scalar_lea.hbm %s1647_s6, %s1359_s26 }
  0x2e   : > { %v414_v3 = vld [vmem:[#allocation7 + $0xf8] sm:$0xff]  ;;  %479 = vmatpush.msra.mxu0 %v398_v1  ;;  %v413_v4 = vld [vmem:[#allocation7 + $0xf0] sm:$0xff]  ;;  %v396_v5 = vld [vmem:[#allocation7 + $0x68] sm:$0xff]  ;;  %vm705_vm4 = vcmask 1041408   ;;  %vm707_vm5 = vcmask 1043459   ;;  %vm709_vm6 = vcmask 1044483  }
  0x2f   : > { %502 = vmatpush.msra.mxu1 %v414_v3  ;;  %v412_v6 = vld [vmem:[#allocation7 + $0xe8] sm:$0xff]  ;;  %v430_v7 = vld [vmem:[#allocation7 + $0x178] sm:$0xff]  ;;  %v395_v8 = vld [vmem:[#allocation7 + $0x60] sm:$0xff]  ;;  %s352_s2 = scalar_select %p351_p1, %s1359_s26, 1  ;;  %vm711_vm7 = vcmask 1042432  }
  0x30   : > { %480 = vmatpush.msra.mxu0 %v397_v2  ;;  %v411_v9 = vld [vmem:[#allocation7 + $0xe0] sm:$0xff]  ;;  %525 = vmatpush.msra.mxu2 %v430_v7  ;;  %v429_v10 = vld [vmem:[#allocation7 + $0x170] sm:$0xff]  ;;  %v394_v11 = vld [vmem:[#allocation7 + $0x58] sm:$0xff]  ;;  %s348_s21 = scalar_lea.vmem [#allocation10], %s1511_s29  ;;  %s968_s22 = sshll.u32 %s964_s20, 4  ;;  %s969_s22 = int_to_ptr.hbm [resolvable:$true] %s968_s22 }
  0x31   : > { %503 = vmatpush.msra.mxu1 %v413_v4  ;;  %v446_v12 = vld [vmem:[#allocation7 + $0x1f8] sm:$0xff]  ;;  %v428_v14 = vld [vmem:[#allocation7 + $0x168] sm:$0xff]  ;;  %v445_v15 = vld [vmem:[#allocation7 + $0x1f0] sm:$0xff]  ;;  %s1096_s4 = sshll.u32 %s352_s2, 4  ;;  %s966_s7 = sshll.u32 %s348_s21, 4  ;;  %s967_s7 = int_to_ptr.vmem [resolvable:$true] %s966_s7 }
  0x32   : > { %481 = vmatpush.msra.mxu0 %v396_v5  ;;  %v410_v13 = vld [vmem:[#allocation7 + $0xd8] sm:$0xff]  ;;  %526 = vmatpush.msra.mxu2 %v429_v10  ;;  %v427_v16 = vld [vmem:[#allocation7 + $0x160] sm:$0xff]  ;;  %v444_v17 = vld [vmem:[#allocation7 + $0x1e8] sm:$0xff]  ;;  %s358_s13 = scalar_lea.vmem %s1642_s1, %s1096_s4  ;;  %s956_s11 = scalar_lea.sflag [#allocation6], %s1511_s29 }
  0x33   : > { %504 = vmatpush.msra.mxu1 %v412_v6  ;;  %548 = vmatpush.msra.mxu3 %v446_v12  ;;  %v393_v18 = vld [vmem:[#allocation7 + $0x50] sm:$0xff]  ;;  %v426_v20 = vld [vmem:[#allocation7 + $0x158] sm:$0xff]  ;;  %v443_v21 = vld [vmem:[#allocation7 + $0x1e0] sm:$0xff]  ;;  %s1295_s14 = sshra.s32 %s969_s22, 4  ;;  %s1301_s4 = scalar_lea.hbm %s1647_s6, 2  ;;  %s1296_s14 = int_to_ptr.hbm [resolvable:$true] %s1295_s14 }
  0x34   : > { %482 = vmatpush.msra.mxu0 %v395_v8  ;;  %v409_v19 = vld [vmem:[#allocation7 + $0xd0] sm:$0xff]  ;;  %527 = vmatpush.msra.mxu2 %v428_v14  ;;  %v392_v22 = vld [vmem:[#allocation7 + $0x48] sm:$0xff]  ;;  %v442_v25 = vld [vmem:[#allocation7 + $0x1d8] sm:$0xff]  ;;  %p1302_p12 = scmp.lt.s32.totalorder %s1296_s14, %s1647_s6 }
  0x35   : > { %505 = vmatpush.msra.mxu1 %v411_v9  ;;  %549 = vmatpush.msra.mxu3 %v445_v15  ;;  %v408_v23 = vld [vmem:[#allocation7 + $0xc8] sm:$0xff]  ;;  %v425_v24 = vld [vmem:[#allocation7 + $0x150] sm:$0xff]  ;;  %v391_v26 = vld [vmem:[#allocation7 + $0x40] sm:$0xff] }
  0x36   : > { %483 = vmatpush.msra.mxu0 %v394_v11  ;;  %528 = vmatpush.msra.mxu2 %v427_v16  ;;  %v407_v27 = vld [vmem:[#allocation7 + $0xc0] sm:$0xff]  ;;  %v424_v28 = vld [vmem:[#allocation7 + $0x148] sm:$0xff]  ;;  %v441_v29 = vld [vmem:[#allocation7 + $0x1d0] sm:$0xff] }
  0x37   : > { %506 = vmatpush.msra.mxu1 %v410_v13  ;;  %550 = vmatpush.msra.mxu3 %v444_v17  ;;  %v390_v30 = vld [vmem:[#allocation7 + $0x38] sm:$0xff]  ;;  %v423_v32 = vld [vmem:[#allocation7 + $0x140] sm:$0xff]  ;;  %v440_v33 = vld [vmem:[#allocation7 + $0x1c8] sm:$0xff] }
  0x38   : > { %484 = vmatpush.msra.mxu0 %v393_v18  ;;  %529 = vmatpush.msra.mxu2 %v426_v20  ;;  %v406_v31 = vld [vmem:[#allocation7 + $0xb8] sm:$0xff]  ;;  %v389_v34 = vld [vmem:[#allocation7 + $0x30] sm:$0xff]  ;;  %v439_v37 = vld [vmem:[#allocation7 + $0x1c0] sm:$0xff] }
  0x39   : > { %507 = vmatpush.msra.mxu1 %v409_v19  ;;  %551 = vmatpush.msra.mxu3 %v443_v21  ;;  %v405_v35 = vld [vmem:[#allocation7 + $0xb0] sm:$0xff]  ;;  %v422_v36 = vld [vmem:[#allocation7 + $0x138] sm:$0xff]  ;;  %v388_v38 = vld [vmem:[#allocation7 + $0x28] sm:$0xff] }
  0x3a   : > { %485 = vmatpush.msra.mxu0 %v392_v22  ;;  %530 = vmatpush.msra.mxu2 %v425_v24  ;;  %v404_v39 = vld [vmem:[#allocation7 + $0xa8] sm:$0xff]  ;;  %v421_v40 = vld [vmem:[#allocation7 + $0x130] sm:$0xff]  ;;  %v438_v41 = vld [vmem:[#allocation7 + $0x1b8] sm:$0xff] }
  0x3b   : > { %508 = vmatpush.msra.mxu1 %v408_v23  ;;  %552 = vmatpush.msra.mxu3 %v442_v25  ;;  %v387_v42 = vld [vmem:[#allocation7 + $0x20] sm:$0xff]  ;;  %v420_v44 = vld [vmem:[#allocation7 + $0x128] sm:$0xff]  ;;  %v437_v45 = vld [vmem:[#allocation7 + $0x1b0] sm:$0xff] }
  0x3c   : > { %486 = vmatpush.msra.mxu0 %v391_v26  ;;  %531 = vmatpush.msra.mxu2 %v424_v28  ;;  %v403_v43 = vld [vmem:[#allocation7 + $0xa0] sm:$0xff]  ;;  %v386_v46 = vld [vmem:[#allocation7 + $0x18] sm:$0xff]  ;;  %v436_v49 = vld [vmem:[#allocation7 + $0x1a8] sm:$0xff] }
  0x3d   : > { %509 = vmatpush.msra.mxu1 %v407_v27  ;;  %553 = vmatpush.msra.mxu3 %v441_v29  ;;  %v402_v47 = vld [vmem:[#allocation7 + $0x98] sm:$0xff]  ;;  %v419_v48 = vld [vmem:[#allocation7 + $0x120] sm:$0xff]  ;;  %v385_v50 = vld [vmem:[#allocation7 + $0x10] sm:$0xff] }
  0x3e   : > { %487 = vmatpush.msra.mxu0 %v390_v30  ;;  %532 = vmatpush.msra.mxu2 %v423_v32  ;;  %v401_v51 = vld [vmem:[#allocation7 + $0x90] sm:$0xff]  ;;  %v418_v52 = vld [vmem:[#allocation7 + $0x118] sm:$0xff]  ;;  %v435_v53 = vld [vmem:[#allocation7 + $0x1a0] sm:$0xff] }
  0x3f   : > { %510 = vmatpush.msra.mxu1 %v406_v31  ;;  %554 = vmatpush.msra.mxu3 %v440_v33  ;;  %v384_v54 = vld [vmem:[#allocation7 + $0x8] sm:$0xff]  ;;  %v417_v56 = vld [vmem:[#allocation7 + $0x110] sm:$0xff]  ;;  %v434_v57 = vld [vmem:[#allocation7 + $0x198] sm:$0xff] }
  0x40   : > { %488 = vmatpush.msra.mxu0 %v389_v34  ;;  %533 = vmatpush.msra.mxu2 %v422_v36  ;;  %v400_v55 = vld [vmem:[#allocation7 + $0x88] sm:$0xff]  ;;  %v383_v58 = vld [vmem:[#allocation7] sm:$0xff]  ;;  %v462_v60 = vld [vmem:[#allocation7 + $0x278] sm:$0xff] }
  0x41   : > { %511 = vmatpush.msra.mxu1 %v405_v35  ;;  %555 = vmatpush.msra.mxu3 %v439_v37  ;;  %v399_v59 = vld [vmem:[#allocation7 + $0x80] sm:$0xff]  ;;  %v478_v61 = vld [vmem:[#allocation7 + $0x2f8] sm:$0xff]  ;;  %v416_v62 = vld [vmem:[#allocation7 + $0x108] sm:$0xff] }
  0x42   : > { %489 = vmatpush.msra.mxu0 %v388_v38  ;;  %534 = vmatpush.msra.mxu2 %v421_v40  ;;  %v433_v63 = vld [vmem:[#allocation7 + $0x190] sm:$0xff]  ;;  %v415_v2 = vld [vmem:[#allocation7 + $0x100] sm:$0xff]  ;;  %v432_v3 = vld [vmem:[#allocation7 + $0x188] sm:$0xff] }
  0x43   : > { %512 = vmatpush.msra.mxu1 %v404_v39  ;;  %556 = vmatpush.msra.mxu3 %v438_v41  ;;  %v461_v0 = vld [vmem:[#allocation7 + $0x270] sm:$0xff]  ;;  %v460_v4 = vld [vmem:[#allocation7 + $0x268] sm:$0xff]  ;;  %v431_v7 = vld [vmem:[#allocation7 + $0x180] sm:$0xff] }
  0x44   : > { %490 = vmatpush.msra.mxu0 %v387_v42  ;;  %535 = vmatpush.msra.mxu2 %v420_v44  ;;  %v477_v1 = vld [vmem:[#allocation7 + $0x2f0] sm:$0xff]  ;;  %v476_v5 = vld [vmem:[#allocation7 + $0x2e8] sm:$0xff]  ;;  %v459_v8 = vld [vmem:[#allocation7 + $0x260] sm:$0xff] }
  0x45   : > { %513 = vmatpush.msra.mxu1 %v403_v43  ;;  %557 = vmatpush.msra.mxu3 %v437_v45  ;;  %v1526_v6 = vld [vmem:[%s1515_s17 + $0x10] sm:$0xff]  ;;  %v475_v9 = vld [vmem:[#allocation7 + $0x2e0] sm:$0xff]  ;;  %v1529_v10 = vld [vmem:[%s1515_s17 + $0x18] sm:$0xff]  ;;  %v1375_v45 = vmov 0  }
  0x46   : > { %491 = vmatpush.msra.mxu0 %v386_v46  ;;  %536 = vmatpush.msra.mxu2 %v419_v48  ;;  %v1532_v11 = vld [vmem:[%s1515_s17] sm:$0xff]  ;;  %v458_v12 = vld [vmem:[#allocation7 + $0x258] sm:$0xff]  ;;  %v1536_v14 = vld [vmem:[%s1515_s17 + $0x8] sm:$0xff] }
  0x47   : > { %514 = vmatpush.msra.mxu1 %v402_v47  ;;  %558 = vmatpush.msra.mxu3 %v436_v49  ;;  %v474_v13 = vld [vmem:[#allocation7 + $0x2d8] sm:$0xff]  ;;  %v457_v15 = vld [vmem:[#allocation7 + $0x250] sm:$0xff]  ;;  %v456_v17 = vld [vmem:[#allocation7 + $0x248] sm:$0xff] }
  0x48   : > { %492 = vmatpush.msra.mxu0 %v385_v50  ;;  %537 = vmatpush.msra.mxu2 %v418_v52  ;;  %v473_v16 = vld [vmem:[#allocation7 + $0x2d0] sm:$0xff]  ;;  %v472_v18 = vld [vmem:[#allocation7 + $0x2c8] sm:$0xff]  ;;  %v1542_v19 = vld [vmem:[%s1515_s17 + $0x40] sm:$0xff] }
  0x49   : > { %515 = vmatpush.msra.mxu1 %v401_v51  ;;  %559 = vmatpush.msra.mxu3 %v435_v53  ;;  %v455_v20 = vld [vmem:[#allocation7 + $0x240] sm:$0xff]  ;;  %v1545_v22 = vld [vmem:[%s1515_s17 + $0x48] sm:$0xff]  ;;  %v1548_v23 = vld [vmem:[%s1515_s17 + $0x30] sm:$0xff] }
  0x4a   : > { %493 = vmatpush.msra.mxu0 %v384_v54  ;;  %538 = vmatpush.msra.mxu2 %v417_v56  ;;  %v471_v21 = vld [vmem:[#allocation7 + $0x2c0] sm:$0xff]  ;;  %v454_v24 = vld [vmem:[#allocation7 + $0x238] sm:$0xff]  ;;  %v453_v27 = vld [vmem:[#allocation7 + $0x230] sm:$0xff] }
  0x4b   : > { %516 = vmatpush.msra.mxu1 %v400_v55  ;;  %560 = vmatpush.msra.mxu3 %v434_v57  ;;  %v470_v25 = vld [vmem:[#allocation7 + $0x2b8] sm:$0xff]  ;;  %v469_v28 = vld [vmem:[#allocation7 + $0x2b0] sm:$0xff]  ;;  %v452_v29 = vld [vmem:[#allocation7 + $0x228] sm:$0xff] }
  0x4c   : > { %494 = vmatpush.msra.mxu0 %v383_v58  ;;  %539 = vmatpush.msra.mxu2 %v416_v62  ;;  %v1552_v26 = vld [vmem:[%s1515_s17 + $0x38] sm:$0xff]  ;;  %v468_v30 = vld [vmem:[#allocation7 + $0x2a8] sm:$0xff]  ;;  %v451_v31 = vld [vmem:[#allocation7 + $0x220] sm:$0xff] }
  0x4d   : > { %517 = vmatpush.msra.mxu1 %v399_v59  ;;  %561 = vmatpush.msra.mxu3 %v433_v63  ;;  %v467_v32 = vld [vmem:[#allocation7 + $0x2a0] sm:$0xff]  ;;  %v450_v33 = vld [vmem:[#allocation7 + $0x218] sm:$0xff]  ;;  %v449_v35 = vld [vmem:[#allocation7 + $0x210] sm:$0xff] }
  0x4e   : > { %571 = vmatpush.msrb.mxu0 %v462_v60  ;;  %540 = vmatpush.msra.mxu2 %v415_v2  ;;  %v466_v34 = vld [vmem:[#allocation7 + $0x298] sm:$0xff]  ;;  %v465_v36 = vld [vmem:[#allocation7 + $0x290] sm:$0xff]  ;;  %v448_v37 = vld [vmem:[#allocation7 + $0x208] sm:$0xff] }
  0x4f   : > { %594 = vmatpush.msrb.mxu1 %v478_v61  ;;  %562 = vmatpush.msra.mxu3 %v432_v3  ;;  %v464_v38 = vld [vmem:[#allocation7 + $0x288] sm:$0xff]  ;;  %v447_v39 = vld [vmem:[#allocation7 + $0x200] sm:$0xff]  ;;  %v1566_v43 = vld [vmem:[%s1515_s17 + $0x50] sm:$0xff] }
  0x50   : > { %572 = vmatpush.msrb.mxu0 %v461_v0  ;;  %541 = vmatmul.f32.vlgmr.msra.gmra.mxu2 %v1526_v6  ;;  %v463_v40 = vld [vmem:[#allocation7 + $0x280] sm:$0xff]  ;;  %v1561_v42 = vld [vmem:[%s1515_s17 + $0x28] sm:$0xff]  ;;  %v1569_v44 = vld [vmem:[%s1515_s17 + $0x58] sm:$0xff] }
  0x51   : > { %595 = vmatpush.msrb.mxu1 %v477_v1  ;;  %563 = vmatpush.msra.mxu3 %v431_v7  ;;  %v1558_v41 = vld [vmem:[%s1515_s17 + $0x20] sm:$0xff]  ;;  %v739_v48 = vld [vmem:[#allocation9 + $0x78] sm:$0xff]  ;;  %v738_v50 = vld [vmem:[#allocation9 + $0x70] sm:$0xff]  ;;  %s1297_s17 = scalar_lea.hbm %s1296_s14, 1 }
  0x52   : > { %573 = vmatpush.msrb.mxu0 %v460_v4  ;;  %564 = vmatmul.f32.vlgmr.msra.gmra.mxu3 %v1529_v10  ;;  %v755_v49 = vld [vmem:[#allocation9 + $0xf8] sm:$0xff]  ;;  %v754_v51 = vld [vmem:[#allocation9 + $0xf0] sm:$0xff]  ;;  %v737_v52 = vld [vmem:[#allocation9 + $0x68] sm:$0xff]  ;;  %p1298_p2 = scmp.ne.s32.totalorder %s1296_s14, %s1297_s17  ;;  %p1303_p13 = scmp.lt.s32.totalorder %s1301_s4, %s1297_s17 }
  0x53   : > { %596 = vmatpush.msrb.mxu1 %v476_v5  ;;  %495 = vmatmul.f32.vlgmr.msra.gmra.mxu0 %v1532_v11  ;;  %v753_v53 = vld [vmem:[#allocation9 + $0xe8] sm:$0xff]  ;;  %v736_v54 = vld [vmem:[#allocation9 + $0x60] sm:$0xff]  ;;  %v735_v58 = vld [vmem:[#allocation9 + $0x58] sm:$0xff] }
  0x54   : > { %574 = vmatpush.msrb.mxu0 %v459_v8  ;;  %518 = vmatmul.f32.vlgmr.msra.gmra.mxu1 %v1536_v14  ;;  %v752_v55 = vld [vmem:[#allocation9 + $0xe0] sm:$0xff]  ;;  %v751_v59 = vld [vmem:[#allocation9 + $0xd8] sm:$0xff]  ;;  %v734_v62 = vld [vmem:[#allocation9 + $0x50] sm:$0xff]  ;;  %p1299_p4 = pnand %p1298_p2, %p1494_p7  ;;  %p1304_p0 = por %p1303_p13, %p1302_p12 }
  0x55   : > { %597 = vmatpush.msrb.mxu1 %v475_v9  ;;  %1189 = vset.pattern.permute.xlu0 %v1375_v45  ;;  %v750_v63 = vld [vmem:[#allocation9 + $0xd0] sm:$0xff]  ;;  %v733_v1 = vld [vmem:[#allocation9 + $0x48] sm:$0xff]  ;;  %v1376_v45 = vmov 0.0  }
  0x56   : > { %575 = vmatpush.msrb.mxu0 %v458_v12  ;;  %834 = vmatpush.msrb.mxu2 %v739_v48  ;;  %v749_v2 = vld [vmem:[#allocation9 + $0xc8] sm:$0xff]  ;;  %v728_v48 = vld [vmem:[#allocation9 + $0x20] sm:$0xff]  ;;  %p1300_p8 = pneg %p1299_p4 }
  0x57   : > { %598 = vmatpush.msrb.mxu1 %v474_v13  ;;  %854 = vmatpush.msrb.mxu3 %v755_v49  ;;  %v381_v13 = vld [vmem:[%s358_s13] sm:$0xff] }
  0x58   : > { %576 = vmatpush.msrb.mxu0 %v457_v15  ;;  %544 = vmatmul.f32.gmra.mxu2 %v1542_v19  ;;  %v1190_v15 = vld [vmem:[#allocation3] ss:$0 sm:$0xff]  ;;  %vm623_vm0 = vcmp.gt.f32.partialorder %v381_v13, 0.0  ;;  %v744_v49 = vld [vmem:[#allocation9 + $0xa0] sm:$0xff]  ;;  %v765_v13 = vld [vmem:[#allocation9 + $0x148] sm:$0xff]  ;;  %p1305_p3 = pnand %p1304_p0, %p1300_p8 }
  0x59   : > { %599 = vmatpush.msrb.mxu1 %v473_v16  ;;  %835 = vmatpush.msrb.mxu2 %v738_v50  ;;  %v771_v50 = vld [vmem:[#allocation9 + $0x178] sm:$0xff] }
  0x5a   : > { %577 = vmatpush.msrb.mxu0 %v456_v17  ;;  %567 = vmatmul.f32.gmra.mxu3 %v1545_v22 }
  0x5b   : > { %600 = vmatpush.msrb.mxu1 %v472_v18  ;;  %498 = vmatmul.f32.gmra.mxu0 %v1548_v23 }
  0x5c   : > { %578 = vmatpush.msrb.mxu0 %v455_v20  ;;  %521 = vmatmul.f32.gmra.mxu1 %v1552_v26 }
  0x5d   : > { %601 = vmatpush.msrb.mxu1 %v471_v21  ;;  %855 = vmatpush.msrb.mxu3 %v754_v51  ;;  %v787_v51 = vld [vmem:[#allocation9 + $0x1f8] sm:$0xff] }
  0x5e   : > { %579 = vmatpush.msrb.mxu0 %v454_v24  ;;  %836 = vmatpush.msrb.mxu2 %v737_v52  ;;  %v727_v52 = vld [vmem:[#allocation9 + $0x18] sm:$0xff] }
  0x5f   : > { %602 = vmatpush.msrb.mxu1 %v470_v25  ;;  %856 = vmatpush.msrb.mxu3 %v753_v53  ;;  %v743_v53 = vld [vmem:[#allocation9 + $0x98] sm:$0xff] }
  0x60   : > { %580 = vmatpush.msrb.mxu0 %v453_v27  ;;  %837 = vmatpush.msrb.mxu2 %v736_v54  ;;  %v770_v54 = vld [vmem:[#allocation9 + $0x170] sm:$0xff] }
  0x61   : > { %603 = vmatpush.msrb.mxu1 %v469_v28  ;;  %857 = vmatpush.msrb.mxu3 %v752_v55  ;;  %v786_v55 = vld [vmem:[#allocation9 + $0x1f0] sm:$0xff] }
  0x62   : > { %581 = vmatpush.msrb.mxu0 %v452_v29  ;;  %838 = vmatpush.msrb.mxu2 %v735_v58  ;;  %v382_v29 = vld [vmem:[%s358_s13 + $0x8] sm:$0xff] }
  0x63   : > { %604 = vmatpush.msrb.mxu1 %v468_v30  ;;  %858 = vmatpush.msrb.mxu3 %v751_v59  ;;  %vm624_vm1 = vcmp.gt.f32.partialorder %v382_v29, 0.0  ;;  %v769_v58 = vld [vmem:[#allocation9 + $0x168] sm:$0xff]  ;;  %v815_v29 = vld [vmem:[#allocation9 + $0x2d8] sm:$0xff] }
  0x64   : > { %582 = vmatpush.msrb.mxu0 %v451_v31  ;;  %839 = vmatpush.msrb.mxu2 %v734_v62  ;;  %v785_v59 = vld [vmem:[#allocation9 + $0x1e8] sm:$0xff]  ;;  %v768_v62 = vld [vmem:[#allocation9 + $0x160] sm:$0xff] }
  0x65   : > { %605 = vmatpush.msrb.mxu1 %v467_v32  ;;  %859 = vmatpush.msrb.mxu3 %v750_v63  ;;  %v784_v63 = vld [vmem:[#allocation9 + $0x1e0] sm:$0xff] }
  0x66   : > { %583 = vmatpush.msrb.mxu0 %v450_v33  ;;  %840 = vmatpush.msrb.mxu2 %v733_v1  ;;  %v732_v33 = vld [vmem:[#allocation9 + $0x40] sm:$0xff] }
  0x67   : > { %606 = vmatpush.msrb.mxu1 %v466_v34  ;;  %860 = vmatpush.msrb.mxu3 %v749_v2  ;;  %v748_v34 = vld [vmem:[#allocation9 + $0xc0] sm:$0xff]  ;;  %v767_v2 = vld [vmem:[#allocation9 + $0x158] sm:$0xff] }
  0x68   : > { %584 = vmatpush.msrb.mxu0 %v449_v35  ;;  %v731_v35 = vld [vmem:[#allocation9 + $0x38] sm:$0xff]  ;;  %841 = vmatpush.msrb.mxu2 %v732_v33  ;;  %v740_v1 = vld [vmem:[#allocation9 + $0x80] sm:$0xff]  ;;  %v814_v33 = vld [vmem:[#allocation9 + $0x2d0] sm:$0xff] }
  0x69   : > { %607 = vmatpush.msrb.mxu1 %v465_v36  ;;  %v364_v36 = vlaneseq  ;;  %861 = vmatpush.msrb.mxu3 %v748_v34  ;;  %v761_v34 = vld [vmem:[#allocation9 + $0x128] sm:$0xff] }
  0x6a   : > { %585 = vmatpush.msrb.mxu0 %v448_v37  ;;  %v747_v37 = vld [vmem:[#allocation9 + $0xb8] sm:$0xff]  ;;  %842 = vmatpush.msrb.mxu2 %v731_v35  ;;  %v777_v35 = vld [vmem:[#allocation9 + $0x1a8] sm:$0xff] }
  0x6b   : > { %608 = vmatpush.msrb.mxu1 %v464_v38  ;;  %v730_v38 = vld [vmem:[#allocation9 + $0x30] sm:$0xff]  ;;  %vm1578_vm2 = vcmp.lt.s32.totalorder %v364_v36, 768  ;;  %862 = vmatpush.msrb.mxu3 %v747_v37  ;;  %v797_v36 = vld [vmem:[#allocation9 + $0x248] sm:$0xff] }
  0x6c   : > { %586 = vmatpush.msrb.mxu0 %v447_v39  ;;  %v746_v39 = vld [vmem:[#allocation9 + $0xb0] sm:$0xff]  ;;  %368 = vst.msk [vmem:[#allocation2] sm:$0x3f] %vm1578_vm2, %v1376_v45  ;;  %843 = vmatpush.msrb.mxu2 %v730_v38  ;;  %v813_v38 = vld [vmem:[#allocation9 + $0x2c8] sm:$0xff]  ;;  %v776_v45 = vld [vmem:[#allocation9 + $0x1a0] sm:$0xff] }
  0x6d   : > { %609 = vmatpush.msrb.mxu1 %v463_v40  ;;  %587 = vmatmul.f32.vlgmr.msrb.gmra.mxu0 %v1558_v41  ;;  %v820_v40 = vld [vmem:[%s1646_s5] sm:$0x1] }
  0x6e   : > { %610 = vmatmul.f32.vlgmr.msrb.gmra.mxu1 %v1561_v42  ;;  %863 = vmatpush.msrb.mxu3 %v746_v39  ;;  %v760_v39 = vld [vmem:[#allocation9 + $0x120] sm:$0xff] }
  0x6f   : > { %874 = vmatpush.msra.mxu0 %v771_v50  ;;  %894 = vmatpush.msra.mxu1 %v787_v51  ;;  %v795_v50 = vld [vmem:[#allocation9 + $0x238] sm:$0xff] }
  0x70   : > { %v811_v51 = vld [vmem:[#allocation9 + $0x2b8] sm:$0xff] }
  0x71   : > { %875 = vmatpush.msra.mxu0 %v770_v54  ;;  %895 = vmatpush.msra.mxu1 %v786_v55  ;;  %v794_v54 = vld [vmem:[#allocation9 + $0x230] sm:$0xff] }
  0x72   : > { %v810_v55 = vld [vmem:[#allocation9 + $0x2b0] sm:$0xff] }
  0x73   : > { %876 = vmatpush.msra.mxu0 %v769_v58  ;;  %896 = vmatpush.msra.mxu1 %v785_v59 }
  0x75   : > { %590 = vmatmul.f32.gmra.mxu0 %v1566_v43  ;;  %897 = vmatpush.msra.mxu1 %v784_v63 }
  0x76   : > { %613 = vmatmul.f32.gmra.mxu1 %v1569_v44  ;;  %877 = vmatpush.msra.mxu0 %v768_v62 }
  0x78   : > { %878 = vmatpush.msra.mxu0 %v767_v2  ;;  %v756_v2 = vld [vmem:[#allocation9 + $0x100] sm:$0xff] }
  0xd0   : > { %v496_v46 = vpop.f32.mrf.mxu0 }
  0xd1   : > { %v519_v47 = vpop.f32.mrf.mxu1 }
  0xd2   : > { %v520_v60 = vadd.f32 %v519_v47, %v496_v46  ;;  %v729_v46 = vld [vmem:[#allocation9 + $0x28] sm:$0xff] }
  0xd3   : > { %v542_v56 = vpop.f32.mrf.mxu2  ;;  %v745_v47 = vld [vmem:[#allocation9 + $0xa8] sm:$0xff]  ;;  %844 = vmatpush.msrb.mxu2 %v729_v46  ;;  %v796_v46 = vld [vmem:[#allocation9 + $0x240] sm:$0xff] }
  0xd4   : > { %v543_v3 = vadd.f32 %v542_v56, %v520_v60  ;;  %864 = vmatpush.msrb.mxu3 %v745_v47  ;;  %v726_v56 = vld [vmem:[#allocation9 + $0x10] sm:$0xff]  ;;  %v725_v60 = vld [vmem:[#allocation9 + $0x8] sm:$0xff]  ;;  %v812_v47 = vld [vmem:[#allocation9 + $0x2c0] sm:$0xff] }
  0xd5   : > { %v565_v0 = vpop.f32.mrf.mxu3  ;;  %845 = vmatpush.msrb.mxu2 %v728_v48  ;;  %v759_v48 = vld [vmem:[#allocation9 + $0x118] sm:$0xff] }
  0xd6   : > { %v566_v4 = vadd.f32 %v565_v0, %v543_v3  ;;  %865 = vmatpush.msrb.mxu3 %v744_v49  ;;  %v724_v0 = vld [vmem:[#allocation9] sm:$0xff]  ;;  %v783_v3 = vld [vmem:[#allocation9 + $0x1d8] sm:$0xff] }
  0xd7   : > { %846 = vmatpush.msrb.mxu2 %v727_v52  ;;  %898 = vmatpush.msra.mxu1 %v783_v3  ;;  %v775_v49 = vld [vmem:[#allocation9 + $0x198] sm:$0xff]  ;;  %v758_v52 = vld [vmem:[#allocation9 + $0x110] sm:$0xff] }
  0xd8   : > { %v499_v57 = vpop.f32.mrf.mxu0  ;;  %866 = vmatpush.msrb.mxu3 %v743_v53  ;;  %v774_v53 = vld [vmem:[#allocation9 + $0x190] sm:$0xff] }
  0xd9   : > { %v522_v61 = vpop.f32.mrf.mxu1  ;;  %847 = vmatpush.msrb.mxu2 %v726_v56  ;;  %v757_v56 = vld [vmem:[#allocation9 + $0x108] sm:$0xff] }
  0xda   : > { %v523_v5 = vadd.f32 %v522_v61, %v499_v57  ;;  %v742_v57 = vld [vmem:[#allocation9 + $0x90] sm:$0xff]  ;;  %v741_v61 = vld [vmem:[#allocation9 + $0x88] sm:$0xff] }
  0xdb   : > { %v545_v7 = vpop.f32.mrf.mxu2  ;;  %867 = vmatpush.msrb.mxu3 %v742_v57  ;;  %848 = vmatpush.msrb.mxu2 %v725_v60  ;;  %v773_v57 = vld [vmem:[#allocation9 + $0x188] sm:$0xff] }
  0xdc   : > { %v546_v16 = vadd.f32 %v545_v7, %v523_v5  ;;  %v819_v5 = vld [vmem:[#allocation9 + $0x2f8] sm:$0xff]  ;;  %v766_v7 = vld [vmem:[#allocation9 + $0x150] sm:$0xff]  ;;  %v793_v60 = vld [vmem:[#allocation9 + $0x228] sm:$0xff] }
  0xdd   : > { %v568_v18 = vpop.f32.mrf.mxu3  ;;  %868 = vmatpush.msrb.mxu3 %v741_v61  ;;  %849 = vmatpush.msrb.mxu2 %v724_v0  ;;  %v809_v61 = vld [vmem:[#allocation9 + $0x2a8] sm:$0xff] }
  0xde   : > { %v569_v21 = vadd.f32 %v568_v18, %v546_v16  ;;  %879 = vmatpush.msra.mxu0 %v766_v7  ;;  %v801_v16 = vld [vmem:[#allocation9 + $0x268] sm:$0xff]  ;;  %v764_v18 = vld [vmem:[#allocation9 + $0x140] sm:$0xff] }
  0xdf   : > { %869 = vmatpush.msrb.mxu3 %v740_v1  ;;  %v792_v7 = vld [vmem:[#allocation9 + $0x220] sm:$0xff] }
  0xe0   : > { %880 = vmatpush.msra.mxu0 %v765_v13 }
  0xe1   : > { %934 = vmatpush.msra.mxu3 %v819_v5  ;;  %v772_v5 = vld [vmem:[#allocation9 + $0x180] sm:$0xff] }
  0xe2   : > { %881 = vmatpush.msra.mxu0 %v764_v18 }
  0xea   : > { %v588_v8 = vpop.f32.mrf.mxu0 }
  0xeb   : > { %v611_v9 = vpop.f32.mrf.mxu1  ;;  %v589_v12 = vadd.f32 %v588_v8, %v566_v4  ;;  %v803_v4 = vld [vmem:[#allocation9 + $0x278] sm:$0xff]  ;;  %v782_v8 = vld [vmem:[#allocation9 + $0x1d0] sm:$0xff] }
  0xec   : > { %914 = vmatpush.msra.mxu2 %v803_v4  ;;  %899 = vmatpush.msra.mxu1 %v782_v8  ;;  %v808_v8 = vld [vmem:[#allocation9 + $0x2a0] sm:$0xff] }
  0xed   : > { %v612_v17 = vadd.f32 %v611_v9, %v589_v12  ;;  %v802_v9 = vld [vmem:[#allocation9 + $0x270] sm:$0xff] }
  0xee   : > { %v818_v12 = vld [vmem:[#allocation9 + $0x2f0] sm:$0xff]  ;;  %915 = vmatpush.msra.mxu2 %v802_v9 }
  0xef   : > { %v621_v20 = vadd.f32 %v1190_v15, %v612_v17  ;;  %935 = vmatpush.msra.mxu3 %v818_v12  ;;  %v817_v17 = vld [vmem:[#allocation9 + $0x2e8] sm:$0xff] }
  0xf0   : > { %916 = vmatpush.msra.mxu2 %v801_v16 }
  0xf1   : > { %v625_v24 = vsel %vm623_vm0, %v621_v20, 0.0  ;;  %936 = vmatpush.msra.mxu3 %v817_v17  ;;  %v780_v20 = vld [vmem:[#allocation9 + $0x1c0] sm:$0xff] }
  0xf2   : > { %v591_v25 = vpop.f32.mrf.mxu0  ;;  %630 = vperm.xlu0 %1189, %v625_v24   ;;  %v816_v24 = vld [vmem:[#allocation9 + $0x2e0] sm:$0xff] }
  0xf3   : > { %v614_v27 = vpop.f32.mrf.mxu1  ;;  %v592_v28 = vadd.f32 %v591_v25, %v569_v21  ;;  %v800_v21 = vld [vmem:[#allocation9 + $0x260] sm:$0xff]  ;;  %937 = vmatpush.msra.mxu3 %v816_v24  ;;  %v763_v25 = vld [vmem:[#allocation9 + $0x138] sm:$0xff] }
  0xf4   : > { %917 = vmatpush.msra.mxu2 %v800_v21  ;;  %882 = vmatpush.msra.mxu0 %v763_v25  ;;  %v806_v21 = vld [vmem:[#allocation9 + $0x290] sm:$0xff] }
  0xf5   : > { %v615_v30 = vadd.f32 %v614_v27, %v592_v28  ;;  %v779_v27 = vld [vmem:[#allocation9 + $0x1b8] sm:$0xff]  ;;  %938 = vmatpush.msra.mxu3 %v815_v29  ;;  %v789_v29 = vld [vmem:[#allocation9 + $0x208] sm:$0xff] }
  0xf6   : > { %v799_v28 = vld [vmem:[#allocation9 + $0x258] sm:$0xff] }
  0xf7   : > { %v622_v31 = vadd.f32 %v1190_v15, %v615_v30  ;;  %v781_v15 = vld [vmem:[#allocation9 + $0x1c8] sm:$0xff]  ;;  %918 = vmatpush.msra.mxu2 %v799_v28  ;;  %v762_v30 = vld [vmem:[#allocation9 + $0x130] sm:$0xff]  ;;  %939 = vmatpush.msra.mxu3 %v814_v33 }
  0xf8   : > { %900 = vmatpush.msra.mxu1 %v781_v15  ;;  %883 = vmatpush.msra.mxu0 %v762_v30  ;;  %v807_v15 = vld [vmem:[#allocation9 + $0x298] sm:$0xff] }
  0xf9   : > { %v626_v32 = vsel %vm624_vm1, %v622_v31, 0.0  ;;  %v778_v31 = vld [vmem:[#allocation9 + $0x1b0] sm:$0xff]  ;;  %940 = vmatpush.msra.mxu3 %v813_v38 }
  0xfa   : > { %635 = vperm.xlu0 %1189, %v626_v32   ;;  %901 = vmatpush.msra.mxu1 %v780_v20  ;;  %v798_v32 = vld [vmem:[#allocation9 + $0x250] sm:$0xff] }
  0xfb   : > { %919 = vmatpush.msra.mxu2 %v798_v32  ;;  %884 = vmatpush.msra.mxu0 %v761_v34  ;;  %v805_v32 = vld [vmem:[#allocation9 + $0x288] sm:$0xff] }
  0xfc   : > { %902 = vmatpush.msra.mxu1 %v779_v27  ;;  %941 = vmatpush.msra.mxu3 %v812_v47 }
  0xfd   : > { %920 = vmatpush.msra.mxu2 %v797_v36  ;;  %885 = vmatpush.msra.mxu0 %v760_v39 }
  0xfe   : > { %903 = vmatpush.msra.mxu1 %v778_v31  ;;  %942 = vmatpush.msra.mxu3 %v811_v51 }
  0xff   : > { %921 = vmatpush.msra.mxu2 %v796_v46  ;;  %886 = vmatpush.msra.mxu0 %v759_v48 }
 0x100   : > { %904 = vmatpush.msra.mxu1 %v777_v35  ;;  %943 = vmatpush.msra.mxu3 %v810_v55 }
 0x101   : > { %922 = vmatpush.msra.mxu2 %v795_v50  ;;  %887 = vmatpush.msra.mxu0 %v758_v52 }
 0x102   : > { %905 = vmatpush.msra.mxu1 %v776_v45  ;;  %944 = vmatpush.msra.mxu3 %v809_v61  ;;  %v804_v45 = vld [vmem:[#allocation9 + $0x280] sm:$0xff] }
 0x103   : > { %923 = vmatpush.msra.mxu2 %v794_v54  ;;  %888 = vmatpush.msra.mxu0 %v757_v56 }
 0x104   : > { %906 = vmatpush.msra.mxu1 %v775_v49  ;;  %945 = vmatpush.msra.mxu3 %v808_v8 }
 0x105   : > { %924 = vmatpush.msra.mxu2 %v793_v60  ;;  %889 = vmatpush.msra.mxu0 %v756_v2 }
 0x106   : > { %907 = vmatpush.msra.mxu1 %v774_v53  ;;  %946 = vmatpush.msra.mxu3 %v807_v15 }
 0x107   : > { %925 = vmatpush.msra.mxu2 %v792_v7 }
 0x108   : > { %908 = vmatpush.msra.mxu1 %v773_v57  ;;  %947 = vmatpush.msra.mxu3 %v806_v21 }
 0x10a   : > { %909 = vmatpush.msra.mxu1 %v772_v5  ;;  %948 = vmatpush.msra.mxu3 %v805_v32 }
 0x10c   : > { %949 = vmatpush.msra.mxu3 %v804_v45 }
 0x164   : > { %v631_v37 = vpop.permute.xlu0 %630 }
 0x165   : > { %v638_v58 = vmul.f32 %v631_v37, %v1532_v11  ;;  %v639_v59 = vmul.f32 %v631_v37, %v1536_v14  ;;  %v640_v62 = vmul.f32 %v631_v37, %v1526_v6  ;;  %v641_v63 = vmul.f32 %v631_v37, %v1529_v10 }
 0x166   : > { %v642_v0 = vmul.f32 %v631_v37, %v1558_v41  ;;  %v643_v6 = vmul.f32 %v631_v37, %v1561_v42  ;;  %v788_v37 = vld [vmem:[#allocation9 + $0x200] sm:$0xff] }
 0x16c   : > { %v636_v1 = vpop.permute.xlu0 %635 }
 0x16d   : > { %v644_v3 = vmul.f32 %v636_v1, %v1548_v23  ;;  %v645_v11 = vmul.f32 %v636_v1, %v1552_v26  ;;  %v646_v14 = vmul.f32 %v636_v1, %v1542_v19  ;;  %v647_v4 = vmul.f32 %v636_v1, %v1545_v22  ;;  %v791_v22 = vld [vmem:[#allocation9 + $0x218] sm:$0xff] }
 0x16e   : > { %v648_v10 = vmul.f32 %v636_v1, %v1566_v43  ;;  %v649_v41 = vmul.f32 %v636_v1, %v1569_v44  ;;  %v790_v44 = vld [vmem:[#allocation9 + $0x210] sm:$0xff]  ;;  %926 = vmatpush.msra.mxu2 %v791_v22 }
 0x16f   : > { %v650_v9 = vadd.f32 %v644_v3, %v638_v58  ;;  %v657_v23 = vadd.f32 %v645_v11, %v639_v59  ;;  %v664_v12 = vadd.f32 %v646_v14, %v640_v62  ;;  %v671_v26 = vadd.f32 %v647_v4, %v641_v63  ;;  %v627_v4 = vld [vmem:[#allocation2] sm:$0x3f] }
 0x170   : > { %v678_v19 = vadd.f32 %v648_v10, %v642_v0  ;;  %v685_v13 = vadd.f32 %v649_v41, %v643_v6  ;;  %927 = vmatpush.msra.mxu2 %v790_v44 }
 0x171   : > { %v651_v16 = vrot.slane %v650_v9, 4  ;;  %v658_v42 = vrot.slane %v657_v23, 4  ;;  %v665_v17 = vrot.slane %v664_v12, 4  ;;  %v672_v43 = vrot.slane %v671_v26, 4 }
 0x172   : > { %v679_v18 = vrot.slane %v678_v19, 4  ;;  %v686_v20 = vrot.slane %v685_v13, 4  ;;  %928 = vmatpush.msra.mxu2 %v789_v29 }
 0x173   : > { %v652_v24 = vadd.f32 %v651_v16, %v650_v9  ;;  %v659_v25 = vadd.f32 %v658_v42, %v657_v23  ;;  %v666_v27 = vadd.f32 %v665_v17, %v664_v12  ;;  %v673_v28 = vadd.f32 %v672_v43, %v671_v26 }
 0x174   : > { %v680_v30 = vadd.f32 %v679_v18, %v678_v19  ;;  %v687_v31 = vadd.f32 %v686_v20, %v685_v13  ;;  %929 = vmatpush.msra.mxu2 %v788_v37 }
 0x175   : > { %v653_v33 = vrot.slane %v652_v24, 2  ;;  %v660_v34 = vrot.slane %v659_v25, 2  ;;  %v667_v35 = vrot.slane %v666_v27, 2  ;;  %v674_v36 = vrot.slane %v673_v28, 2 }
 0x176   : > { %v681_v38 = vrot.slane %v680_v30, 2  ;;  %v688_v39 = vrot.slane %v687_v31, 2 }
 0x177   : > { %v654_v46 = vadd.f32 %v653_v33, %v652_v24  ;;  %v661_v47 = vadd.f32 %v660_v34, %v659_v25  ;;  %v668_v48 = vadd.f32 %v667_v35, %v666_v27  ;;  %v675_v49 = vadd.f32 %v674_v36, %v673_v28 }
 0x178   : > { %v682_v50 = vadd.f32 %v681_v38, %v680_v30  ;;  %v689_v51 = vadd.f32 %v688_v39, %v687_v31 }
 0x179   : > { %v655_v52 = vrot.slane %v654_v46, 1  ;;  %v662_v53 = vrot.slane %v661_v47, 1  ;;  %v669_v54 = vrot.slane %v668_v48, 1  ;;  %v676_v55 = vrot.slane %v675_v49, 1 }
 0x17a   : > { %v683_v56 = vrot.slane %v682_v50, 1  ;;  %v690_v57 = vrot.slane %v689_v51, 1 }
 0x17b   : > { %v663_v58 = vadd.f32 %v662_v53, %v661_v47  ;;  %v670_v59 = vadd.f32 %v669_v54, %v668_v48  ;;  %v677_v60 = vadd.f32 %v676_v55, %v675_v49  ;;  %v656_v63 = vadd.f32 %v655_v52, %v654_v46 }
 0x17c   : > { %v684_v61 = vadd.f32 %v683_v56, %v682_v50  ;;  %v691_v62 = vadd.f32 %v690_v57, %v689_v51 }
 0x17d   : > { %v698_v0 = vrot.slane %v663_v58, 7  ;;  %v699_v1 = vrot.slane %v670_v59, 6  ;;  %v700_v2 = vrot.slane %v677_v60, 5 }
 0x17e   : > { %v701_v3 = vrot.slane %v684_v61, 4  ;;  %v702_v11 = vrot.slane %v691_v62, 3 }
 0x17f   : > { %v704_v14 = vsel %vm703_vm3, %v656_v63, %v698_v0 }
 0x180   : > { %v706_v5 = vsel %vm705_vm4, %v704_v14, %v699_v1  ;;  %v708_v7 = vsel %vm707_vm5, %v700_v2, %v701_v3 }
 0x181   : > { %v710_v6 = vsel %vm709_vm6, %v708_v7, %v702_v11 }
 0x182   : > { %v712_v10 = vsel %vm711_vm7, %v706_v5, %v710_v6 }
 0x183   : > { %v714_v41 = vadd.f32 %v712_v10, %v627_v4 }
 0x185   : > { %719 = vst.msk [vmem:[#allocation2] sm:$0x3f] %vm1578_vm2, %v714_v41 }
 0x18c   : > { %v723_v8 = vld [vmem:[#allocation2] sm:$0x3f] }
 0x18d   : > { %v822_v9 = vperm.slane %v723_v8, 0  ;;  %v823_v23 = vperm.slane %v723_v8, 1  ;;  %v824_v12 = vperm.slane %v723_v8, 2  ;;  %v825_v26 = vperm.slane %v723_v8, 3 }
 0x18e   : > { %v826_v19 = vperm.slane %v723_v8, 4  ;;  %v827_v13 = vperm.slane %v723_v8, 5 }
 0x18f   : > { %850 = vmatmul.f32.vlgmr.msrb.gmra.mxu2 %v822_v9  ;;  %870 = vmatmul.f32.vlgmr.msrb.gmra.mxu3 %v823_v23 }
 0x190   : > { %890 = vmatmul.f32.vlgmr.msra.gmra.mxu0 %v824_v12  ;;  %910 = vmatmul.f32.vlgmr.msra.gmra.mxu1 %v825_v26 }
 0x197   : > { %930 = vmatmul.f32.vlgmr.msra.gmra.mxu2 %v826_v19  ;;  %950 = vmatmul.f32.vlgmr.msra.gmra.mxu3 %v827_v13 }
 0x20d   : > { %v891_v17 = vpop.f32.mrf.mxu0  ;;  %v911_v44 = vpop.f32.mrf.mxu1 }
 0x212   : > { %v851_v22 = vpop.f32.mrf.mxu2  ;;  %v871_v15 = vpop.f32.mrf.mxu3 }
 0x213   : > { %v852_v16 = vadd.f32 %v851_v22, %v820_v40 }
 0x215   : > { %v872_v42 = vadd.f32 %v871_v15, %v852_v16 }
 0x217   : > { %v892_v43 = vadd.f32 %v891_v17, %v872_v42 }
 0x219   : > { %v912_v18 = vadd.f32 %v911_v44, %v892_v43 }
 0x21a   : > { %v931_v20 = vpop.f32.mrf.mxu2  ;;  %v951_v24 = vpop.f32.mrf.mxu3 }
 0x21b   : > { %v932_v21 = vadd.f32 %v931_v20, %v912_v18 }
 0x21d   : > { %v952_v25 = vadd.f32 %v951_v24, %v932_v21 }
 0x21f   : > { %954 = vst [vmem:[%s348_s21] sm:$0x1] %v952_v25 }
 0x220   : > { %1308 = shalt.err (!%p1305_p3)
}
 0x221   : > { %1110 = dma.vmem_to_hbm [thread:$0]  (%p1494_p7), %s967_s7, 16, %s969_s22, %s956_s11  }
 0x222 PF: > { %s980_s29 = sand.u32 1, %s1347_s23   ;;  %p1124_p5 = pnand %p1087_p11, %p1464_p6 }
 0x223   : > { %s981_s13 = scalar_lea.sflag [#allocation6], %s980_s29 }
 0x224   : > { %p1125_p9 = pneg %p1124_p5 }
 0x226   : > { %1342 = dma.done.wait (%p1125_p9), %s981_s13, 16  }
 0x227   : > { %1344 = vsyncadd (%p1125_p9), %s981_s13, 4294967280  ;;  %s25_s28 = sadd.s32 1, %s1367_s28   ;;  %s1660_s23 = smov %s1351_s24 }
 0x228   : > { %p22_p10 = scmp.ge.s32.totalorder %s25_s28, 4   ;;  %s1661_s24 = smov %s1355_s25 }
 0x229   : > { %s1662_s25 = smov %s1502_s15  ;;  %s1663_s26 = smov %s1363_s27 }
 0x22a   : > { %s1664_s27 = smov %s1666_s3  ;;  %24 = sbr.rel (!%p22_p10) target bundleno = 10 (0xa), region = 108 }
 0x22f   :  { %986 = vsyncpa [#allocation5], 1 }
 0x230   :  { %988 = vsyncpa [#allocation5 + $0x1], 1 }
 0x231   :  { %989 = vsyncpa [#allocation8], 1 }
 0x232   :  { %990 = vsyncpa [#allocation6], 1 }
 0x233   :  { %992 = vsyncpa [#allocation6 + $0x1], 1 }

</bundles_post_ra>
